<compile_context>
chip_gen: v6e
topology: v6e:2x2x1
jax: 0.10.0
libtpu: 0.0.40
codegen_flags: <defaults>
</compile_context>

<pallas_src>
import functools

import jax
import jax.numpy as jnp
from jax.experimental import pallas as pl
from jax.experimental.pallas import tpu as pltpu


def convblock_kernel(p_ref, w_ref, b_ref, o_ref, *, instance_norm, negative_slope, eps):
    """Fused GEMM + bias + InstanceNorm2d + LeakyReLU for one batch element.

    p_ref: (1, C_in*K*K, HW)   im2col patches for this batch element
    w_ref: (C_out, C_in*K*K)   reshaped conv weight (resident across grid)
    b_ref: (C_out, 1)          conv bias           (resident across grid)
    o_ref: (1, C_out, HW)      output, HW = H_out*W_out is the lane-dense dim
    """
    p = p_ref[0].astype(jnp.float32)           # (CKK, HW)
    w = w_ref[...].astype(jnp.float32)         # (C_out, CKK)

    # Conv2d as a single MXU matmul with f32 accumulation.
    y = jnp.dot(w, p, preferred_element_type=jnp.float32,
                precision=jax.lax.Precision.HIGHEST)          # (C_out, HW)
    y = y + b_ref[...].astype(jnp.float32)                    # (C_out, 1) broadcast

    if instance_norm:
        # InstanceNorm2d(out_c): per-channel mean/var over the spatial extent,
        # biased variance, eps=1e-5, affine=False (PyTorch defaults).
        mean = jnp.mean(y, axis=1, keepdims=True)
        yc = y - mean
        var = jnp.mean(yc * yc, axis=1, keepdims=True)
        y = yc * jax.lax.rsqrt(var + eps)

    # LeakyReLU(negative_slope)
    y = jnp.where(y >= 0.0, y, negative_slope * y)

    o_ref[0] = y.astype(o_ref.dtype)


def _im2col_nchw(xp, K, stride, H_out, W_out):
    """XLA-side patch extraction. Returns (B, C_in*K*K, H_out*W_out) with the
    flattened patch index ordered as c*(K*K) + ky*K + kx, matching
    weight.reshape(C_out, C_in*K*K)."""
    B, C, _, _ = xp.shape
    cols = []
    for ky in range(K):
        for kx in range(K):
            xs = xp[:, :,
                    ky: ky + (H_out - 1) * stride + 1: stride,
                    kx: kx + (W_out - 1) * stride + 1: stride]      # (B, C, H_out, W_out)
            cols.append(xs.reshape(B, C, 1, H_out * W_out))
    patches = jnp.concatenate(cols, axis=2)                          # (B, C, K*K, HW)
    return patches.reshape(B, C * K * K, H_out * W_out)


def conv_block(x, weight, bias, *, stride=1, padding=1, instance_norm=True,
               negative_slope=0.2, eps=1e-5):
    """Pallas implementation of ConvBlock.forward for NCHW float input."""
    B, C_in, H, W = x.shape
    C_out, C_in_w, K, K2 = weight.shape
    assert C_in == C_in_w and K == K2, (weight.shape, x.shape)

    H_out = (H + 2 * padding - K) // stride + 1
    W_out = (W + 2 * padding - K) // stride + 1
    HW = H_out * W_out
    CKK = C_in * K * K

    # Zero padding + im2col in the wrapper (pure data movement; see TODO above).
    xp = jnp.pad(x, ((0, 0), (0, 0), (padding, padding), (padding, padding)))
    patches = _im2col_nchw(xp, K, stride, H_out, W_out)       # (B, CKK, HW)
    w2 = weight.reshape(C_out, CKK)                           # (C_out, CKK)
    b2 = bias.reshape(C_out, 1).astype(jnp.float32)           # (C_out, 1)

    kernel = functools.partial(
        convblock_kernel,
        instance_norm=instance_norm,
        negative_slope=negative_slope,
        eps=eps,
    )

    out_flat = pl.pallas_call(
        kernel,
        out_shape=jax.ShapeDtypeStruct((B, C_out, HW), x.dtype),
        grid=(B,),
        in_specs=[
            # Per-batch patch tile; last dim HW is a multiple of 128 -> lane dense.
            pl.BlockSpec((1, CKK, HW), lambda bidx: (bidx, 0, 0)),
            # Weight / bias: constant block index -> fetched once, VMEM resident.
            pl.BlockSpec((C_out, CKK), lambda bidx: (0, 0)),
            pl.BlockSpec((C_out, 1), lambda bidx: (0, 0)),
        ],
        out_specs=pl.BlockSpec((1, C_out, HW), lambda bidx: (bidx, 0, 0)),
        compiler_params=pltpu.CompilerParams(
            dimension_semantics=("parallel",),
        ),
    )(patches, w2, b2)

    return out_flat.reshape(B, C_out, H_out, W_out)


def conv_block_ref(x, weight, bias, *, stride=1, padding=1, instance_norm=True,
                   negative_slope=0.2, eps=1e-5):
    """Plain-JAX reference mirroring the torch ConvBlock (for verification)."""
    y = jax.lax.conv_general_dilated(
        x.astype(jnp.float32), weight.astype(jnp.float32),
        window_strides=(stride, stride),
        padding=((padding, padding), (padding, padding)),
        dimension_numbers=("NCHW", "OIHW", "NCHW"),
        precision=jax.lax.Precision.HIGHEST)
    y = y + bias.reshape(1, -1, 1, 1).astype(jnp.float32)
    if instance_norm:
        mean = y.mean(axis=(2, 3), keepdims=True)
        var = ((y - mean) ** 2).mean(axis=(2, 3), keepdims=True)
        y = (y - mean) * jax.lax.rsqrt(var + eps)
    y = jnp.where(y >= 0.0, y, negative_slope * y)
    return y.astype(x.dtype)


if __name__ == "__main__":
    key = jax.random.PRNGKey(0)
    kx, kw, kb = jax.random.split(key, 3)

    B, C_in, H, W = 2, 4, 16, 16
    C_out, K, stride, padding = 8, 3, 1, 1

    x = jax.random.normal(kx, (B, C_in, H, W), dtype=jnp.float32)
    w = jax.random.normal(kw, (C_out, C_in, K, K), dtype=jnp.float32) / jnp.sqrt(C_in * K * K)
    b = jax.random.normal(kb, (C_out,), dtype=jnp.float32) * 0.1

    ok = True
    for use_in in (True, False):   # Instacne_layer=True (default) and False paths
        out = conv_block(x, w, b, stride=stride, padding=padding, instance_norm=use_in)
        out = jax.block_until_ready(out)
        ref = conv_block_ref(x, w, b, stride=stride, padding=padding, instance_norm=use_in)
        assert out.shape == (B, C_out, H, W), out.shape
        err = float(jnp.max(jnp.abs(out - ref)))
        if not jnp.allclose(out, ref, atol=1e-4, rtol=1e-4):
            ok = False
            print(f"mismatch (instance_norm={use_in}): max abs err = {err}")

    if ok:
        print("KERNEL_OK")
</pallas_src>

<mosaic_0001>
module attributes {stable_mosaic.version = 11 : i64} {
  func.func @convblock_kernel(%arg0: i32, %arg1: memref<1x36x256xf32, #tpu.memory_space<vmem>>, %arg2: memref<8x36xf32, #tpu.memory_space<vmem>>, %arg3: memref<8x1xf32, #tpu.memory_space<vmem>>, %arg4: memref<1x8x256xf32, #tpu.memory_space<vmem>>) attributes {dimension_semantics = [#tpu.dimension_semantics<parallel>], iteration_bounds = array<i64: 2>, scalar_prefetch = 0 : i64, scratch_operands = 0 : i64, tpu.core_type = #tpu.core_type<tc>, window_params = [{transform_indices = @transform_0, window_bounds = array<i64: 1, 36, 256>}, {pipeline_mode = #tpu.pipeline_mode<synchronous>, transform_indices = @transform_1, window_bounds = array<i64: 8, 36>}, {pipeline_mode = #tpu.pipeline_mode<synchronous>, transform_indices = @transform_2, window_bounds = array<i64: 8, 1>}, {transform_indices = @transform_3, window_bounds = array<i64: 1, 8, 256>}]} {
    %c0 = arith.constant 0 : index
    %c0_0 = arith.constant 0 : index
    %c0_1 = arith.constant 0 : index
    %0 = vector.load %arg1[%c0, %c0_0, %c0_1] : memref<1x36x256xf32, #tpu.memory_space<vmem>>, vector<1x36x256xf32>
    %1 = vector.shape_cast %0 : vector<1x36x256xf32> to vector<36x256xf32>
    %c0_2 = arith.constant 0 : index
    %c0_3 = arith.constant 0 : index
    %2 = vector.load %arg2[%c0_2, %c0_3] : memref<8x36xf32, #tpu.memory_space<vmem>>, vector<8x36xf32>
    %cst = arith.constant dense<0.000000e+00> : vector<8x256xf32>
    %3 = tpu.matmul %2, %1, %cst {dimension_numbers = #tpu.dot_dimension_numbers<[1], [0], [0], [1], [0, 0, 1, 1], [], []>, precision = #tpu.contract_precision<fp32>} : vector<8x36xf32>, vector<36x256xf32>, vector<8x256xf32> -> vector<8x256xf32>
    %c0_4 = arith.constant 0 : index
    %c0_5 = arith.constant 0 : index
    %4 = vector.load %arg3[%c0_4, %c0_5] : memref<8x1xf32, #tpu.memory_space<vmem>>, vector<8x1xf32>
    %5 = vector.broadcast %4 : vector<8x1xf32> to vector<8x256xf32>
    %6 = arith.addf %3, %5 : vector<8x256xf32>
    %cst_6 = arith.constant dense<0.000000e+00> : vector<8xf32>
    %7 = vector.multi_reduction <add>, %6, %cst_6 [1] : vector<8x256xf32> to vector<8xf32>
    %8 = vector.shape_cast %7 : vector<8xf32> to vector<8x1xf32>
    %cst_7 = arith.constant 2.560000e+02 : f32
    %9 = vector.broadcast %cst_7 : f32 to vector<8x1xf32>
    %10 = arith.divf %8, %9 : vector<8x1xf32>
    %11 = vector.broadcast %10 : vector<8x1xf32> to vector<8x256xf32>
    %12 = arith.subf %6, %11 : vector<8x256xf32>
    %13 = arith.mulf %12, %12 : vector<8x256xf32>
    %cst_8 = arith.constant dense<0.000000e+00> : vector<8xf32>
    %14 = vector.multi_reduction <add>, %13, %cst_8 [1] : vector<8x256xf32> to vector<8xf32>
    %15 = vector.shape_cast %14 : vector<8xf32> to vector<8x1xf32>
    %cst_9 = arith.constant 2.560000e+02 : f32
    %16 = vector.broadcast %cst_9 : f32 to vector<8x1xf32>
    %17 = arith.divf %15, %16 : vector<8x1xf32>
    %cst_10 = arith.constant 9.99999974E-6 : f32
    %18 = vector.broadcast %cst_10 : f32 to vector<8x1xf32>
    %19 = arith.addf %17, %18 : vector<8x1xf32>
    %20 = math.rsqrt %19 : vector<8x1xf32>
    %21 = vector.broadcast %20 : vector<8x1xf32> to vector<8x256xf32>
    %22 = arith.mulf %12, %21 : vector<8x256xf32>
    %cst_11 = arith.constant 0.000000e+00 : f32
    %23 = vector.broadcast %cst_11 : f32 to vector<8x256xf32>
    %24 = arith.cmpf oge, %22, %23 : vector<8x256xf32>
    %cst_12 = arith.constant 2.000000e-01 : f32
    %25 = vector.broadcast %cst_12 : f32 to vector<8x256xf32>
    %26 = arith.mulf %25, %22 : vector<8x256xf32>
    %27 = arith.select %24, %22, %26 : vector<8x256xi1>, vector<8x256xf32>
    %c0_13 = arith.constant 0 : index
    %c0_14 = arith.constant 0 : index
    %c0_15 = arith.constant 0 : index
    %28 = vector.load %arg4[%c0_13, %c0_14, %c0_15] : memref<1x8x256xf32, #tpu.memory_space<vmem>>, vector<1x8x256xf32>
    %29 = vector.shape_cast %28 : vector<1x8x256xf32> to vector<8x256xf32>
    %30 = vector.shape_cast %27 : vector<8x256xf32> to vector<1x8x256xf32>
    tpu.vector_store %arg4[%c0_13, %c0_14, %c0_15], %30 {strides = array<i32>} : memref<1x8x256xf32, #tpu.memory_space<vmem>>, vector<1x8x256xf32>,
    return
  }
  func.func @transform_0(%arg0: i32) -> (i32, i32, i32) {
    %c0_i32 = arith.constant 0 : i32
    %c0_i32_0 = arith.constant 0 : i32
    %c0_i32_1 = arith.constant 0 : i32
    return %arg0, %c0_i32, %c0_i32_0 : i32, i32, i32
  }
  func.func @transform_1(%arg0: i32) -> (i32, i32) {
    %c0_i32 = arith.constant 0 : i32
    %c0_i32_0 = arith.constant 0 : i32
    %c0_i32_1 = arith.constant 0 : i32
    return %c0_i32, %c0_i32_0 : i32, i32
  }
  func.func @transform_2(%arg0: i32) -> (i32, i32) {
    %c0_i32 = arith.constant 0 : i32
    %c0_i32_0 = arith.constant 0 : i32
    %c0_i32_1 = arith.constant 0 : i32
    return %c0_i32, %c0_i32_0 : i32, i32
  }
  func.func @transform_3(%arg0: i32) -> (i32, i32, i32) {
    %c0_i32 = arith.constant 0 : i32
    %c0_i32_0 = arith.constant 0 : i32
    %c0_i32_1 = arith.constant 0 : i32
    return %arg0, %c0_i32, %c0_i32_0 : i32, i32, i32
  }
}

</mosaic_0001>

<bundles_post_ra>
// kernel: tpu_custom_call.1
= control target key start
LH: loop header
LB: loop body
LE: loop exit
PB: predicated region body
PF: predicated region fallthrough
CT: control target
= control target key end

     0   :  { %8 = vsyncpa [#allocation3], 0  ;;  %s1265_s0 = inlined_call_operand.vmem [shape: f32[2,36,256], index: 0, kind: input, shape index: {}]   ;;  %s1266_s1 = inlined_call_operand.vmem [shape: f32[8,36], index: 1, kind: input, shape index: {}]   ;;  %s1267_s2 = inlined_call_operand.vmem [shape: f32[8,1], index: 2, kind: input, shape index: {}]   ;;  %s1268_s3 = inlined_call_operand.hbm [shape: f32[2,8,256], index: 3, kind: output, shape index: {}]  }
   0x1   :  { %10 = vsyncpa [#allocation3 + $0x1], 0  ;;  %s1007_s12 = smov 0   ;;  %s1009_s13 = smov 0  }
   0x2   :  { %s1011_s14 = smov 0   ;;  %s1013_s15 = smov 0  }
   0x3 LB: > { %s1028_s16 = sadd.s32 4294967295, %s982_s15   ;;  %s865_s17 = sadd.s32 4294967294, %s982_s15   ;;  %s982_s15 = sphi %s1013_s15, %s1274_s15   ;;  %s978_s14 = sphi %s1011_s14, %s1273_s14   ;;  %s974_s13 = sphi %s1009_s13, %s1272_s13   ;;  %s970_s12 = sphi %s1007_s12, %s1271_s12  }
   0x4   : > { %s1032_s18 = sadd.s32 1, %s982_s15   ;;  %s91_s19 = sadd.s32 1, %s978_s14 }
   0x5   : > { %s88_s20 = ssub.s32 %s982_s15, %s1032_s18  ;;  %p101_p0 = scmp.ne.s32.totalorder %s978_s14, %s974_s13 }
   0x6   : > { %p89_p1 = scmp.eq.s32.totalorder %s88_s20, 0  ;;  %p102_p2 = scmp.eq.s32.totalorder %s1028_s16, 1 }
   0x7   : > { %p107_p3 = scmp.ne.s32.totalorder %s974_s13, %s970_s12  ;;  %p108_p4 = scmp.eq.s32.totalorder %s865_s17, 1 }
   0x8   : > { %s1043_s21 = scalar_select %p89_p1, %s978_s14, %s91_s19  }
   0x9   : > { %p1045_p5 = por %p102_p2, %p101_p0  ;;  %p1049_p6 = por %p108_p4, %p107_p3 }
   0xa   : > { %p868_p7 = scmp.ge.s32.totalorder %s982_s15, 1  ;;  %p140_p8 = scmp.lt.s32.totalorder %s982_s15, 3 }
   0xc   : > { %p141_p9 = pnand %p868_p7, %p140_p8 }
   0xd   : > { %p164_p10 = scmp.lt.s32.totalorder (!%p141_p9), %s1028_s16, 1  ;;  %s161_s6 = sand.u32 (!%p141_p9), 1, %s974_s13  }
   0xe   : > { %144 = sbr.rel (%p141_p9) target bundleno = 589 (0x24d), region = 32  ;;  %s869_s7 = sshll.u32 (!%p141_p9), %s161_s6, 4 }
   0xf   : > { %s876_s8 = sshll.u32 (!%p141_p9), %s1028_s16, 8  ;;  %s163_s9 = scalar_lea.vmem (!%p141_p9), [#allocation2], %s869_s7 }
  0x10   : > { %s806_s10 = sshll.u32 (!%p141_p9), %s163_s9, 4  ;;  %s1224_s19 = scalar_lea.hbm (!%p141_p9), %s1268_s3, %s876_s8  ;;  %s1226_s10 = int_to_ptr.vmem [resolvable:$true] %s806_s10 }
  0x11   : > { %s922_s20 = scalar_lea.vmem (!%p141_p9), %s1226_s10, 256  ;;  %s986_s24 = smov (!%p141_p9), [#allocation2]  }
  0x12   : > { %p923_p11 = scmp.ne.s32.totalorder (!%p141_p9), %s1226_s10, %s922_s20  ;;  %s926_s25 = sshll.u32 (!%p141_p9), %s986_s24, 4  ;;  %s927_s25 = int_to_ptr.vmem [resolvable:$false] %s926_s25 }
  0x13   : > { %v179_v0 = vld [vmem:[%s1266_s1] sm:$0xff]  ;;  %vm186_vm0 = vcmask 293888   ;;  %v984_v1 = vmov 0.0   ;;  %s165_s28 = scalar_select %p164_p10, %s1028_s16, 1  ;;  %v985_v5 = vmov 0   ;;  %vm190_vm1 = vcmask 1043456  }
  0x14   : > { %271 = vmatprep.mubr.f32.mxu0 %v984_v1  ;;  %v188_v2 = vsel %vm186_vm0, %v179_v0, 0  ;;  %397 = vmatprep.mubr.f32.mxu1 %v984_v1  ;;  %v180_v3 = vld [vmem:[%s1267_s2] sm:$0xff]  ;;  %s792_s16 = scalar_lea.sflag [#allocation3], %s161_s6  ;;  %p924_p12 = pnand %p923_p11, %p1045_p5 }
  0x15   : > { %v1065_v4 = vand.u32 4294901760, %v188_v2  ;;  %919 = vset.pattern.permute.xlu0 %v985_v5  ;;  %s877_s29 = smul.u32 80, %s165_s28  ;;  %s928_s26 = scalar_lea.vmem %s927_s25, 512 }
  0x16   : > { %183 = vperm.xlu0 %919, %v180_v3   ;;  %p925_p13 = pneg %p924_p12  ;;  %p929_p0 = scmp.lt.s32.totalorder %s1226_s10, %s927_s25 }
  0x17   : > { %v1068_v6 = vsub.f32 %v188_v2, %v1065_v4  ;;  %s168_s5 = scalar_lea.vmem %s1265_s0, %s877_s29  ;;  %p930_p1 = scmp.lt.s32.totalorder %s928_s26, %s922_s20 }
  0x18   : > { %v178_v7 = vld [vmem:[%s168_s5 + $0x48] sm:$0xf]  ;;  %v177_v8 = vld [vmem:[%s168_s5 + $0x40] sm:$0xf]  ;;  %v176_v9 = vld [vmem:[%s168_s5 + $0x38] sm:$0xff] }
  0x19   : > { %v274_v10 = vand.u32 4294901760, %v1068_v6  ;;  %v195_v11 = vsel %vm190_vm1, %v178_v7, 0  ;;  %v192_v12 = vsel %vm190_vm1, %v177_v8, 0  ;;  %v1074_v13 = vand.u32 4294901760, %v176_v9  ;;  %v175_v14 = vld [vmem:[%s168_s5 + $0x30] sm:$0xff]  ;;  %v174_v15 = vld [vmem:[%s168_s5 + $0x28] sm:$0xff]  ;;  %p931_p2 = por %p930_p1, %p929_p0 }
  0x1a   : > { %v173_v16 = vld [vmem:[%s168_s5 + $0x20] sm:$0xff]  ;;  %v1076_v17 = vand.u32 4294901760, %v195_v11  ;;  %v1078_v18 = vand.u32 4294901760, %v192_v12  ;;  %v1080_v19 = vand.u32 4294901760, %v175_v14  ;;  %v1082_v20 = vand.u32 4294901760, %v174_v15  ;;  %v172_v21 = vld [vmem:[%s168_s5 + $0x18] sm:$0xff] }
  0x1b   : > { %v171_v22 = vld [vmem:[%s168_s5 + $0x10] sm:$0xff]  ;;  %v1084_v23 = vand.u32 4294901760, %v173_v16  ;;  %v1086_v24 = vand.u32 4294901760, %v172_v21  ;;  %v170_v26 = vld [vmem:[%s168_s5 + $0x8] sm:$0xff]  ;;  %v169_v27 = vld [vmem:[%s168_s5] sm:$0xff]  ;;  %v1091_v28 = vsub.f32 %v176_v9, %v1074_v13  ;;  %v275_v32 = vsub.f32 %v1068_v6, %v274_v10  ;;  %p932_p3 = pnand %p931_p2, %p925_p13 }
  0x1c   : > { %v1088_v25 = vand.u32 4294901760, %v171_v22  ;;  %220 = vmatprep.subr.mxu0 %v1076_v17  ;;  %v1094_v29 = vand.u32 4294901760, %v170_v26  ;;  %v1097_v30 = vsub.f32 %v195_v11, %v1076_v17  ;;  %v1100_v31 = vsub.f32 %v192_v12, %v1078_v18 }
  0x1d   : > { %222 = vmatpush1.msra.mxu0 %v1078_v18  ;;  %v1106_v33 = vand.u32 4294901760, %v169_v27  ;;  %v319_v34 = vand.u32 4294901760, %v1091_v28  ;;  %v1110_v35 = vsub.f32 %v175_v14, %v1080_v19  ;;  %v1113_v36 = vsub.f32 %v174_v15, %v1082_v20 }
  0x1e   : > { %224 = vmatprep.subr.mxu0 %v1074_v13  ;;  %v307_v37 = vand.u32 4294901760, %v1097_v30  ;;  %v313_v38 = vand.u32 4294901760, %v1100_v31  ;;  %v1119_v39 = vsub.f32 %v173_v16, %v1084_v23  ;;  %v1122_v40 = vsub.f32 %v172_v21, %v1086_v24 }
  0x1f   : > { %226 = vmatpush1.msra.mxu0 %v1080_v19  ;;  %v320_v41 = vsub.f32 %v1091_v28, %v319_v34  ;;  %v325_v42 = vand.u32 4294901760, %v1110_v35  ;;  %v331_v43 = vand.u32 4294901760, %v1113_v36  ;;  %v1131_v44 = vsub.f32 %v171_v22, %v1088_v25 }
  0x20   : > { %228 = vmatprep.subr.mxu0 %v1082_v20  ;;  %v308_v45 = vsub.f32 %v1097_v30, %v307_v37  ;;  %v314_v46 = vsub.f32 %v1100_v31, %v313_v38  ;;  %v337_v47 = vand.u32 4294901760, %v1119_v39  ;;  %v343_v48 = vand.u32 4294901760, %v1122_v40 }
  0x21   : > { %230 = vmatpush1.msra.mxu0 %v1084_v23  ;;  %v321_v49 = vand.u32 4294901760, %v320_v41  ;;  %v326_v50 = vsub.f32 %v1110_v35, %v325_v42  ;;  %v332_v51 = vsub.f32 %v1113_v36, %v331_v43  ;;  %v349_v52 = vand.u32 4294901760, %v1131_v44 }
  0x22   : > { %232 = vmatprep.subr.mxu0 %v1086_v24  ;;  %v309_v53 = vand.u32 4294901760, %v308_v45  ;;  %v315_v54 = vand.u32 4294901760, %v314_v46  ;;  %v338_v55 = vsub.f32 %v1119_v39, %v337_v47  ;;  %v344_v56 = vsub.f32 %v1122_v40, %v343_v48 }
  0x23   : > { %234 = vmatpush1.msra.mxu0 %v1088_v25  ;;  %v276_v57 = vand.u32 4294901760, %v275_v32  ;;  %v327_v58 = vand.u32 4294901760, %v326_v50  ;;  %v350_v59 = vsub.f32 %v1131_v44, %v349_v52  ;;  %v354_v60 = vsub.f32 %v170_v26, %v1094_v29 }
  0x24   : > { %236 = vmatprep.subr.mxu0 %v1094_v29  ;;  %310 = vmatprep.subr.mxu1 %v309_v53  ;;  %v333_v61 = vand.u32 4294901760, %v332_v51  ;;  %v360_v62 = vsub.f32 %v169_v27, %v1106_v33  ;;  %v339_v63 = vand.u32 4294901760, %v338_v55  ;;  %v345_v2 = vand.u32 4294901760, %v344_v56 }
  0x25   : > { %238 = vmatpush1.msra.mxu0 %v1106_v33  ;;  %316 = vmatpush1.msra.mxu1 %v315_v54  ;;  %v355_v0 = vand.u32 4294901760, %v354_v60  ;;  %v351_v5 = vand.u32 4294901760, %v350_v59 }
  0x26   : > { %322 = vmatprep.subr.mxu1 %v321_v49  ;;  %429 = vmatprep.subr.mxu0 %v1097_v30  ;;  %v361_v3 = vand.u32 4294901760, %v360_v62 }
  0x27   : > { %277 = vmatmul.mubr.f32.vlgmr.msra.gmra.mxu0 %v276_v57  ;;  %328 = vmatpush1.msra.mxu1 %v327_v58  ;;  %v356_v7 = vsub.f32 %v354_v60, %v355_v0 }
  0x28   : > { %432 = vmatpush1.msra.mxu0 %v1100_v31  ;;  %334 = vmatprep.subr.mxu1 %v333_v61  ;;  %v362_v8 = vsub.f32 %v360_v62, %v361_v3 }
  0x29   : > { %435 = vmatprep.subr.mxu0 %v1091_v28  ;;  %340 = vmatpush1.msra.mxu1 %v339_v63  ;;  %v357_v9 = vand.u32 4294901760, %v356_v7 }
  0x2a   : > { %438 = vmatpush1.msra.mxu0 %v1110_v35  ;;  %346 = vmatprep.subr.mxu1 %v345_v2  ;;  %v363_v11 = vand.u32 4294901760, %v362_v8 }
  0x2b   : > { %441 = vmatprep.subr.mxu0 %v1113_v36  ;;  %352 = vmatpush1.msra.mxu1 %v351_v5 }
  0x2c   : > { %444 = vmatpush1.msra.mxu0 %v1119_v39  ;;  %358 = vmatprep.subr.mxu1 %v357_v9 }
  0x2d   : > { %447 = vmatprep.subr.mxu0 %v1122_v40  ;;  %364 = vmatpush1.msra.mxu1 %v363_v11 }
  0x2e   : > { %450 = vmatpush1.msra.mxu0 %v1131_v44  ;;  %399 = vmatmul.mubr.f32.vlgmr.msra.gmra.mxu1 %v1065_v4 }
  0x2f   : > { %453 = vmatprep.subr.mxu0 %v354_v60  ;;  %521 = vmatprep.subr.mxu1 %v1076_v17 }
  0x30   : > { %456 = vmatpush1.msra.mxu0 %v360_v62  ;;  %489 = vmatprep.mubr.f32.mxu0 %v984_v1 }
  0x31   : > { %523 = vmatpush1.msra.mxu1 %v1078_v18  ;;  %492 = vmatmul.mubr.f32.vlgmr.msra.gmra.mxu0 %v1068_v6 }
  0x32   : > { %525 = vmatprep.subr.mxu1 %v1074_v13  ;;  %607 = vmatprep.subr.mxu0 %v307_v37 }
  0x33   : > { %527 = vmatpush1.msra.mxu1 %v1080_v19  ;;  %611 = vmatpush1.msra.mxu0 %v313_v38 }
  0x34   : > { %529 = vmatprep.subr.mxu1 %v1082_v20  ;;  %615 = vmatprep.subr.mxu0 %v319_v34 }
  0x35   : > { %531 = vmatpush1.msra.mxu1 %v1084_v23  ;;  %619 = vmatpush1.msra.mxu0 %v325_v42 }
  0x36   : > { %533 = vmatprep.subr.mxu1 %v1086_v24  ;;  %623 = vmatprep.subr.mxu0 %v331_v43 }
  0x37   : > { %535 = vmatpush1.msra.mxu1 %v1088_v25  ;;  %627 = vmatpush1.msra.mxu0 %v337_v47 }
  0x38   : > { %537 = vmatprep.subr.mxu1 %v1094_v29  ;;  %631 = vmatprep.subr.mxu0 %v343_v48 }
  0x39   : > { %539 = vmatpush1.msra.mxu1 %v1106_v33  ;;  %572 = vmatprep.mubr.f32.mxu1 %v984_v1 }
  0x3a   : > { %635 = vmatpush1.msra.mxu0 %v349_v52  ;;  %576 = vmatmul.mubr.f32.vlgmr.msra.gmra.mxu1 %v274_v10 }
  0x3b   : > { %639 = vmatprep.subr.mxu0 %v355_v0  ;;  %707 = vmatprep.subr.mxu1 %v1076_v17 }
  0x3c   : > { %643 = vmatpush1.msra.mxu0 %v361_v3  ;;  %676 = vmatprep.mubr.f32.mxu0 %v984_v1 }
  0x3d   : > { %709 = vmatpush1.msra.mxu1 %v1078_v18  ;;  %678 = vmatmul.mubr.f32.vlgmr.msra.gmra.mxu0 %v1065_v4 }
  0x3e   : > { %711 = vmatprep.subr.mxu1 %v1074_v13  ;;  %758 = vmatprep.mubr.f32.mxu1 %v984_v1 }
  0x3f   : > { %713 = vmatpush1.msra.mxu1 %v1080_v19 }
  0x40   : > { %715 = vmatprep.subr.mxu1 %v1082_v20 }
  0x41   : > { %717 = vmatpush1.msra.mxu1 %v1084_v23 }
  0x42   : > { %719 = vmatprep.subr.mxu1 %v1086_v24 }
  0x43   : > { %721 = vmatpush1.msra.mxu1 %v1088_v25 }
  0x44   : > { %723 = vmatprep.subr.mxu1 %v1094_v29 }
  0x45   : > { %725 = vmatpush1.msra.mxu1 %v1106_v33 }
  0x46   : > { %760 = vmatmul.mubr.f32.vlgmr.msra.gmra.mxu1 %v1065_v4 }
  0x91   : > { %v184_v10 = vpop.permute.xlu0 %183 }
  0xe7   : > { %v278_v6 = vpop.f32.mrf.mxu0 }
  0xe8   : > { %v279_v13 = vadd.f32 %v278_v6, %v184_v10 }
  0xe9   : > { %v280_v12 = vpop.f32.mrf.mxu0 }
  0xea   : > { %v281_v14 = vadd.f32 %v280_v12, %v184_v10 }
  0xee   : > { %v400_v1 = vpop.f32.mrf.mxu1 }
  0xef   : > { %v401_v18 = vadd.f32 %v400_v1, %v279_v13 }
  0xf0   : > { %v402_v15 = vpop.f32.mrf.mxu1 }
  0xf1   : > { %v493_v16 = vpop.f32.mrf.mxu0  ;;  %v403_v19 = vadd.f32 %v402_v15, %v281_v14 }
  0xf2   : > { %v494_v23 = vadd.f32 %v493_v16, %v401_v18 }
  0xf3   : > { %v495_v20 = vpop.f32.mrf.mxu0 }
  0xf4   : > { %v496_v24 = vadd.f32 %v495_v20, %v403_v19 }
  0xfa   : > { %v577_v17 = vpop.f32.mrf.mxu1 }
  0xfb   : > { %v578_v25 = vadd.f32 %v577_v17, %v494_v23 }
  0xfc   : > { %v579_v21 = vpop.f32.mrf.mxu1 }
  0xfd   : > { %v679_v22 = vpop.f32.mrf.mxu0  ;;  %v580_v26 = vadd.f32 %v579_v21, %v496_v24 }
  0xfe   : > { %v680_v28 = vadd.f32 %v679_v22, %v578_v25 }
  0xff   : > { %v681_v27 = vpop.f32.mrf.mxu0 }
 0x100   : > { %v682_v29 = vadd.f32 %v681_v27, %v580_v26 }
 0x106   : > { %v761_v4 = vpop.f32.mrf.mxu1 }
 0x107   : > { %v762_v31 = vadd.f32 %v761_v4, %v680_v28 }
 0x108   : > { %v763_v30 = vpop.f32.mrf.mxu1 }
 0x109   : > { %v764_v32 = vadd.f32 %v763_v30, %v682_v29 }
 0x10b   : > { %v766_v33 = vadd.f32 %v764_v32, %v762_v31 }
 0x10d   : > { %767 = vadd.xlane.f32.xlu0 %v766_v33 }
 0x196   : > { %v768_v34 = vpop.xlane.xlu0 %767 }
 0x197   : > { %v770_v35 = vmul.f32 0.00390625, %v768_v34 }
 0x199   : > { %v771_v36 = vsub.f32 %v762_v31, %v770_v35  ;;  %v772_v37 = vsub.f32 %v764_v32, %v770_v35 }
 0x19b   : > { %v773_v38 = vmul.f32 %v771_v36, %v771_v36  ;;  %v774_v39 = vmul.f32 %v772_v37, %v772_v37 }
 0x19d   : > { %v775_v40 = vadd.f32 %v774_v39, %v773_v38 }
 0x19f   : > { %776 = vadd.xlane.f32.xlu1 %v775_v40 }
 0x228   : > { %v777_v41 = vpop.xlane.xlu1 %776 }
 0x229   : > { %v778_v42 = vmul.f32 0.00390625, %v777_v41 }
 0x22b   : > { %v779_v43 = vadd.f32 1e-05, %v778_v42 }
 0x22d   : > { %920 = vrsqrt.f32 %v779_v43 }
 0x23a   : > { %v921_v44 = vpop.eup %920 }
 0x23b   : > { %v781_v45 = vmul.f32 %v921_v44, %v771_v36  ;;  %v782_v46 = vmul.f32 %v921_v44, %v772_v37 }
 0x23d   : > { %vm783_vm2 = vcmp.ge.f32.partialorder %v781_v45, 0.0  ;;  %vm784_vm3 = vcmp.ge.f32.partialorder %v782_v46, 0.0  ;;  %v785_v47 = vmul.f32 0.2, %v781_v45  ;;  %v786_v48 = vmul.f32 0.2, %v782_v46 }
 0x23f   : > { %v787_v49 = vsel %vm783_vm2, %v781_v45, %v785_v47  ;;  %v788_v50 = vsel %vm784_vm3, %v782_v46, %v786_v48 }
 0x240   : > { %789 = vst [vmem:[%s163_s9] sm:$0xff] %v787_v49  ;;  %790 = vst [vmem:[%s163_s9 + $0x8] sm:$0xff] %v788_v50 }
 0x241   : > { %935 = shalt.err (!%p932_p3)
}
 0x242   : > { %s936_s27 = scalar_lea.hbm %s1224_s19, 256  ;;  %s940_s30 = scalar_lea.hbm %s1268_s3, 512 }
 0x243   : > { %p937_p4 = scmp.ne.s32.totalorder %s1224_s19, %s936_s27  ;;  %p941_p9 = scmp.lt.s32.totalorder %s1224_s19, %s1268_s3 }
 0x244   : > { %p942_p10 = scmp.lt.s32.totalorder %s940_s30, %s936_s27 }
 0x245   : > { %p938_p7 = pnand %p937_p4, %p1045_p5 }
 0x246   : > { %p943_p11 = por %p942_p10, %p941_p9 }
 0x247   : > { %p939_p8 = pneg %p938_p7 }
 0x249   : > { %p944_p12 = pnand %p943_p11, %p939_p8 }
 0x24b   : > { %947 = shalt.err (!%p944_p12)
}
 0x24c   : > { %878 = dma.vmem_to_hbm [thread:$0]  (%p1045_p5), %s1226_s10, 256, %s1224_s19, %s792_s16  }
 0x24d PF: > { %p884_p13 = scmp.ge.s32.totalorder %s982_s15, 2  ;;  %s818_s6 = sand.u32 1, %s970_s12  }
 0x24e   : > { %s819_s7 = scalar_lea.sflag [#allocation3], %s818_s6 }
 0x24f   : > { %p881_p0 = pnand %p884_p13, %p1049_p6 }
 0x251   : > { %p882_p1 = pneg %p881_p0 }
 0x253   : > { %965 = dma.done.wait (%p882_p1), %s819_s7, 256  }
 0x254   : > { %967 = vsyncadd (%p882_p1), %s819_s7, 4294967040  ;;  %p13_p2 = scmp.ge.s32.totalorder %s1032_s18, 4   ;;  %s1271_s12 = smov %s974_s13 }
 0x255   : > { %s1272_s13 = smov %s978_s14  ;;  %s1273_s14 = smov %s1043_s21 }
 0x256   : > { %s1274_s15 = smov %s1032_s18  ;;  %15 = sbr.rel (!%p13_p2) target bundleno = 3 (0x3), region = 67 }
 0x25b   :  { %824 = vsyncpa [#allocation3], 1 }
 0x25c   :  { %826 = vsyncpa [#allocation3 + $0x1], 1 }

</bundles_post_ra>
